<compile_context>
chip_gen: v5e
topology: v5e:2x2
jax: 0.10.0
libtpu: 0.0.40
codegen_flags: <defaults>
</compile_context>

<pallas_src>
import functools

import jax
import jax.numpy as jnp
from jax import lax
from jax.experimental import pallas as pl
from jax.experimental.pallas import tpu as pltpu

EPS = 1e-12  # matches torch.nn.functional.normalize default eps


def _netvlad_kernel(x_ref, w_ref, c_ref, b_ref, o_ref, *, bn, s):
    # x_ref: (D, Bn*S) lane-dense slab for Bn images
    # w_ref: (K, D)   conv weights = 2*beta*centroids (scale folded in wrapper)
    # c_ref: (K, D)   raw centroids (for the residual term)
    # b_ref: (K, 1)   conv bias (= -beta * ||centroid_k||)
    # o_ref: (1, Bn, K, D) normalized VLAD for the Bn images of this step
    x = x_ref[...].astype(jnp.float32)        # (D, Bn*S)
    w = w_ref[...].astype(jnp.float32)        # (K, D)
    c = c_ref[...].astype(jnp.float32)        # (K, D)
    b = b_ref[...].astype(jnp.float32)        # (K, 1)

    # 1x1 conv for all Bn images in one MXU call (natural orientation:
    # contraction over w's lane axis and x's sublane axis).
    scores = jnp.dot(w, x, preferred_element_type=jnp.float32) + b       # (K, Bn*S)

    # Softmax over the cluster axis K (sublane axis) -- lane-dense tile.
    m = jnp.max(scores, axis=0, keepdims=True)
    e = jnp.exp(scores - m)
    inv = pl.reciprocal(jnp.sum(e, axis=0, keepdims=True), approx=False)
    soft = e * inv                                                        # (K, Bn*S)

    # Per-image aggregation + fused normalization (statically unrolled,
    # all slices are 128-lane aligned and static).
    for i in range(bn):
        x_i = x[:, i * s:(i + 1) * s]         # (D, S)
        soft_i = soft[:, i * s:(i + 1) * s]   # (K, S)

        a_i = jnp.sum(soft_i, axis=1, keepdims=True)                      # (K, 1)
        # soft_i @ x_i^T: lane-lane contraction (A.B^T form) -- keeps the
        # big x tile in its (D, S) layout, no transpose of x needed.
        sx_i = lax.dot_general(soft_i, x_i, (((1,), (1,)), ((), ())),
                               preferred_element_type=jnp.float32)        # (K, D)
        vlad = sx_i - a_i * c                                             # (K, D)

        # Fused intra (per-cluster over D) + global L2 normalization:
        # a single (K, D) scaling pass; eps clamps the *norms* to preserve
        # F.normalize semantics exactly.
        rowsq = jnp.sum(vlad * vlad, axis=1, keepdims=True)               # (K, 1)
        intra_inv = 1.0 / jnp.maximum(jnp.sqrt(rowsq), EPS)               # (K, 1)
        g_sq = jnp.sum(rowsq * (intra_inv * intra_inv))
        g_inv = 1.0 / jnp.maximum(jnp.sqrt(g_sq), EPS)
        vlad = vlad * (intra_inv * g_inv)                                 # (K, D)

        o_ref[0, i] = vlad.astype(o_ref.dtype)


def _pick_bn(n, s, max_cols=4096):
    """Pick images-per-step: divisor of n, lane-aligned block, >=2 grid steps."""
    candidates = []
    for bn in range(1, n + 1):
        if n % bn:
            continue
        lane_ok = ((bn * s) % 128 == 0) or (bn == n)   # partial blocks lane-aligned
        if lane_ok:
            candidates.append(bn)
    good = [bn for bn in candidates
            if bn * s <= max_cols and (n // bn >= 2 or n == 1)]
    if good:
        return max(good)
    return min(candidates)


def netvlad_forward(x_nchw, centroids, conv_bias, beta, *, bn=None):
    """x_nchw: (N, D, H, W) float32. Returns (N, K*D) float32."""
    N, D, H, W = x_nchw.shape
    K = centroids.shape[0]
    S = H * W
    if bn is None:
        bn = _pick_bn(N, S)
    grid = N // bn

    # Lane-dense x slab: (D, N*S), column index = n*S + s.
    x = jnp.transpose(x_nchw.reshape(N, D, S), (1, 0, 2)).reshape(D, N * S)
    # Fold the 2*beta scale into the conv weights once, outside the grid.
    w = (2.0 * float(beta)) * centroids
    bias2d = conv_bias.reshape(K, 1)

    out = pl.pallas_call(
        functools.partial(_netvlad_kernel, bn=bn, s=S),
        out_shape=jax.ShapeDtypeStruct((grid, bn, K, D), jnp.float32),
        grid_spec=pltpu.PrefetchScalarGridSpec(
            num_scalar_prefetch=0,
            grid=(grid,),
            in_specs=[
                pl.BlockSpec((D, bn * S), lambda g: (0, g)),
                pl.BlockSpec((K, D), lambda g: (0, 0)),   # resident across grid
                pl.BlockSpec((K, D), lambda g: (0, 0)),   # resident across grid
                pl.BlockSpec((K, 1), lambda g: (0, 0)),   # resident across grid
            ],
            out_specs=pl.BlockSpec((1, bn, K, D), lambda g: (g, 0, 0, 0)),
        ),
        compiler_params=pltpu.CompilerParams(
            dimension_semantics=("parallel",)),
    )(x, w, centroids, bias2d)

    # Contiguous (free) reshape to the flattened NetVLAD descriptor order
    # (image, then k-major, d-minor) -- same HBM bytes, no data movement.
    return out.reshape(N, K * D)


def netvlad_reference(x_nchw, centroids, conv_bias, beta):
    """Pure-JAX reference mirroring the PyTorch forward exactly."""
    N, D, H, W = x_nchw.shape
    K = centroids.shape[0]
    S = H * W
    x = x_nchw.reshape(N, D, S)
    scores = 2.0 * beta * jnp.einsum("kd,nds->nks", centroids, x) + conv_bias[None, :, None]
    soft = jax.nn.softmax(scores, axis=1)                         # (N, K, S)
    residual = x[:, None, :, :] - centroids[None, :, :, None]     # (N, K, D, S)
    residual = residual * soft[:, :, None, :]
    vlad = residual.sum(axis=-1)                                  # (N, K, D)
    vlad = vlad / jnp.maximum(
        jnp.linalg.norm(vlad, axis=2, keepdims=True), EPS)
    vlad = vlad.reshape(N, -1)
    vlad = vlad / jnp.maximum(
        jnp.linalg.norm(vlad, axis=1, keepdims=True), EPS)
    return vlad


if __name__ == "__main__":
    # Small shapes consistent with the module: NCHW input, K clusters, D channels.
    N, D, H, W = 2, 16, 16, 16
    K = 8
    beta = 2.0

    key = jax.random.PRNGKey(0)
    k_x, k_c = jax.random.split(key)

    x = jax.random.normal(k_x, (N, D, H, W), dtype=jnp.float32)
    # Deterministic param init mirroring the module's __init__:
    #   centroids ~ U[0, 1); conv.weight = 2*beta*centroids; conv.bias = -beta*||centroid||
    centroids = jax.random.uniform(k_c, (K, D), dtype=jnp.float32)
    conv_bias = -beta * jnp.linalg.norm(centroids, axis=1)

    out = netvlad_forward(x, centroids, conv_bias, beta)
    out = jax.block_until_ready(out)

    ref = netvlad_reference(x, centroids, conv_bias, beta)
    assert out.shape == (N, K * D)
    assert jnp.allclose(out, ref, atol=1e-5, rtol=1e-5), "mismatch vs reference"

    print("KERNEL_OK")
</pallas_src>

<mosaic_0001>
module attributes {stable_mosaic.version = 11 : i64} {
  func.func @_netvlad_kernel(%arg0: i32, %arg1: memref<16x256xf32, #tpu.memory_space<vmem>>, %arg2: memref<8x16xf32, #tpu.memory_space<vmem>>, %arg3: memref<8x16xf32, #tpu.memory_space<vmem>>, %arg4: memref<8x1xf32, #tpu.memory_space<vmem>>, %arg5: memref<1x1x8x16xf32, #tpu.memory_space<vmem>>) attributes {dimension_semantics = [#tpu.dimension_semantics<parallel>], iteration_bounds = array<i64: 2>, scalar_prefetch = 0 : i64, scratch_operands = 0 : i64, tpu.core_type = #tpu.core_type<tc>, window_params = [{transform_indices = @transform_0, window_bounds = array<i64: 16, 256>}, {pipeline_mode = #tpu.pipeline_mode<synchronous>, transform_indices = @transform_1, window_bounds = array<i64: 8, 16>}, {pipeline_mode = #tpu.pipeline_mode<synchronous>, transform_indices = @transform_2, window_bounds = array<i64: 8, 16>}, {pipeline_mode = #tpu.pipeline_mode<synchronous>, transform_indices = @transform_3, window_bounds = array<i64: 8, 1>}, {transform_indices = @transform_4, window_bounds = array<i64: 1, 1, 8, 16>}]} {
    %c0 = arith.constant 0 : index
    %c0_0 = arith.constant 0 : index
    %0 = vector.load %arg1[%c0, %c0_0] : memref<16x256xf32, #tpu.memory_space<vmem>>, vector<16x256xf32>
    %c0_1 = arith.constant 0 : index
    %c0_2 = arith.constant 0 : index
    %1 = vector.load %arg2[%c0_1, %c0_2] : memref<8x16xf32, #tpu.memory_space<vmem>>, vector<8x16xf32>
    %c0_3 = arith.constant 0 : index
    %c0_4 = arith.constant 0 : index
    %2 = vector.load %arg3[%c0_3, %c0_4] : memref<8x16xf32, #tpu.memory_space<vmem>>, vector<8x16xf32>
    %c0_5 = arith.constant 0 : index
    %c0_6 = arith.constant 0 : index
    %3 = vector.load %arg4[%c0_5, %c0_6] : memref<8x1xf32, #tpu.memory_space<vmem>>, vector<8x1xf32>
    %cst = arith.constant dense<0.000000e+00> : vector<8x256xf32>
    %4 = tpu.matmul %1, %0, %cst {dimension_numbers = #tpu.dot_dimension_numbers<[1], [0], [0], [1], [0, 0, 1, 1], [], []>} : vector<8x16xf32>, vector<16x256xf32>, vector<8x256xf32> -> vector<8x256xf32>
    %5 = vector.broadcast %3 : vector<8x1xf32> to vector<8x256xf32>
    %6 = arith.addf %4, %5 : vector<8x256xf32>
    %cst_7 = arith.constant dense<0xFF800000> : vector<256xf32>
    %7 = vector.multi_reduction <maximumf>, %6, %cst_7 [0] : vector<8x256xf32> to vector<256xf32>
    %8 = vector.shape_cast %7 : vector<256xf32> to vector<1x256xf32>
    %9 = vector.broadcast %8 : vector<1x256xf32> to vector<8x256xf32>
    %10 = arith.subf %6, %9 : vector<8x256xf32>
    %11 = math.exp %10 : vector<8x256xf32>
    %cst_8 = arith.constant dense<0.000000e+00> : vector<256xf32>
    %12 = vector.multi_reduction <add>, %11, %cst_8 [0] : vector<8x256xf32> to vector<256xf32>
    %13 = vector.shape_cast %12 : vector<256xf32> to vector<1x256xf32>
    %14 = tpu.reciprocal %13 : vector<1x256xf32> -> vector<1x256xf32>
    %15 = vector.broadcast %14 : vector<1x256xf32> to vector<8x256xf32>
    %16 = arith.mulf %11, %15 : vector<8x256xf32>
    %cst_9 = arith.constant dense<0.000000e+00> : vector<8xf32>
    %17 = vector.multi_reduction <add>, %16, %cst_9 [1] : vector<8x256xf32> to vector<8xf32>
    %18 = vector.shape_cast %17 : vector<8xf32> to vector<8x1xf32>
    %cst_10 = arith.constant dense<0.000000e+00> : vector<8x16xf32>
    %19 = tpu.matmul %16, %0, %cst_10 {dimension_numbers = #tpu.dot_dimension_numbers<[1], [1], [0], [0], [0, 0, 1, 0], [], []>} : vector<8x256xf32>, vector<16x256xf32>, vector<8x16xf32> -> vector<8x16xf32>
    %20 = vector.broadcast %18 : vector<8x1xf32> to vector<8x16xf32>
    %21 = arith.mulf %20, %2 : vector<8x16xf32>
    %22 = arith.subf %19, %21 : vector<8x16xf32>
    %23 = arith.mulf %22, %22 : vector<8x16xf32>
    %cst_11 = arith.constant dense<0.000000e+00> : vector<8xf32>
    %24 = vector.multi_reduction <add>, %23, %cst_11 [1] : vector<8x16xf32> to vector<8xf32>
    %25 = vector.shape_cast %24 : vector<8xf32> to vector<8x1xf32>
    %26 = math.sqrt %25 : vector<8x1xf32>
    %cst_12 = arith.constant 9.99999996E-13 : f32
    %27 = vector.broadcast %cst_12 : f32 to vector<8x1xf32>
    %28 = arith.maximumf %26, %27 : vector<8x1xf32>
    %cst_13 = arith.constant 1.000000e+00 : f32
    %29 = vector.broadcast %cst_13 : f32 to vector<8x1xf32>
    %30 = arith.divf %29, %28 : vector<8x1xf32>
    %31 = arith.mulf %30, %30 : vector<8x1xf32>
    %32 = arith.mulf %25, %31 : vector<8x1xf32>
    %33 = vector.shape_cast %32 : vector<8x1xf32> to vector<1x8x1xf32>
    %cst_14 = arith.constant dense<0.000000e+00> : vector<1xf32>
    %34 = vector.multi_reduction <add>, %33, %cst_14 [1, 2] : vector<1x8x1xf32> to vector<1xf32>
    %35 = vector.shape_cast %34 : vector<1xf32> to vector<1x1x1xf32>
    %36 = vector.extract %35[0, 0, 0] : f32 from vector<1x1x1xf32>
    %37 = math.sqrt %36 : f32
    %cst_15 = arith.constant 9.99999996E-13 : f32
    %38 = arith.maximumf %37, %cst_15 : f32
    %cst_16 = arith.constant 1.000000e+00 : f32
    %39 = arith.divf %cst_16, %38 : f32
    %40 = vector.broadcast %39 : f32 to vector<8x1xf32>
    %41 = arith.mulf %30, %40 : vector<8x1xf32>
    %42 = vector.broadcast %41 : vector<8x1xf32> to vector<8x16xf32>
    %43 = arith.mulf %22, %42 : vector<8x16xf32>
    %c0_17 = arith.constant 0 : index
    %c0_18 = arith.constant 0 : index
    %c0_19 = arith.constant 0 : index
    %c0_20 = arith.constant 0 : index
    %44 = vector.load %arg5[%c0_17, %c0_18, %c0_19, %c0_20] : memref<1x1x8x16xf32, #tpu.memory_space<vmem>>, vector<1x1x8x16xf32>
    %45 = vector.shape_cast %44 : vector<1x1x8x16xf32> to vector<8x16xf32>
    %46 = vector.shape_cast %43 : vector<8x16xf32> to vector<1x1x8x16xf32>
    tpu.vector_store %arg5[%c0_17, %c0_18, %c0_19, %c0_20], %46 {strides = array<i32>} : memref<1x1x8x16xf32, #tpu.memory_space<vmem>>, vector<1x1x8x16xf32>,
    return
  }
  func.func @transform_0(%arg0: i32) -> (i32, i32) {
    %c0_i32 = arith.constant 0 : i32
    %c0_i32_0 = arith.constant 0 : i32
    return %c0_i32, %arg0 : i32, i32
  }
  func.func @transform_1(%arg0: i32) -> (i32, i32) {
    %c0_i32 = arith.constant 0 : i32
    %c0_i32_0 = arith.constant 0 : i32
    %c0_i32_1 = arith.constant 0 : i32
    return %c0_i32, %c0_i32_0 : i32, i32
  }
  func.func @transform_2(%arg0: i32) -> (i32, i32) {
    %c0_i32 = arith.constant 0 : i32
    %c0_i32_0 = arith.constant 0 : i32
    %c0_i32_1 = arith.constant 0 : i32
    return %c0_i32, %c0_i32_0 : i32, i32
  }
  func.func @transform_3(%arg0: i32) -> (i32, i32) {
    %c0_i32 = arith.constant 0 : i32
    %c0_i32_0 = arith.constant 0 : i32
    %c0_i32_1 = arith.constant 0 : i32
    return %c0_i32, %c0_i32_0 : i32, i32
  }
  func.func @transform_4(%arg0: i32) -> (i32, i32, i32, i32) {
    %c0_i32 = arith.constant 0 : i32
    %c0_i32_0 = arith.constant 0 : i32
    %c0_i32_1 = arith.constant 0 : i32
    %c0_i32_2 = arith.constant 0 : i32
    return %arg0, %c0_i32, %c0_i32_0, %c0_i32_1 : i32, i32, i32, i32
  }
}

</mosaic_0001>

<bundles_post_ra>
// kernel: tpu_custom_call.1
= control target key start
LH: loop header
LB: loop body
LE: loop exit
PB: predicated region body
PF: predicated region fallthrough
CT: control target
= control target key end

     0   :  { %s995_s0 = inlined_call_operand.hbm [shape: f32[16,512], index: 0, kind: input, shape index: {}]   ;;  %s996_s1 = inlined_call_operand.vmem [shape: f32[8,16], index: 1, kind: input, shape index: {}]   ;;  %s997_s2 = inlined_call_operand.hbm [shape: f32[8,16], index: 2, kind: input, shape index: {}]   ;;  %s998_s3 = inlined_call_operand.vmem [shape: f32[8,1], index: 3, kind: input, shape index: {}]   ;;  %s999_s4 = inlined_call_operand.hbm [shape: f32[2,1,8,16], index: 4, kind: output, shape index: {}]  }
   0x1   :  { %1000 = sst [smem:[#allocation11_spill]] %s997_s2 }
   0x2   :  { %9 = vsyncpa [#allocation3], 0 }
   0x3   :  { %11 = vsyncpa [#allocation3 + $0x1], 0 }
   0x4   :  { %12 = vsyncpa [#allocation6], 0 }
   0x5   :  { %13 = vsyncpa [#allocation4], 0 }
   0x6   :  { %15 = vsyncpa [#allocation4 + $0x1], 0  ;;  %s837_s15 = smov 0   ;;  %s839_s16 = smov 0  }
   0x7   :  { %s841_s17 = smov 0   ;;  %s843_s18 = smov 0  }
   0x8 LB: > { %s858_s19 = sadd.s32 4294967295, %s804_s18   ;;  %s571_s20 = sadd.s32 4294967294, %s804_s18   ;;  %s804_s18 = sphi %s843_s18, %s1012_s18   ;;  %s800_s17 = sphi %s841_s17, %s1011_s17   ;;  %s796_s16 = sphi %s839_s16, %s1010_s16   ;;  %s792_s15 = sphi %s837_s15, %s1009_s15  }
   0x9   : > { %s862_s21 = sadd.s32 1, %s804_s18   ;;  %s28_s22 = sadd.s32 1, %s800_s17 }
   0xa   : > { %s25_s23 = ssub.s32 %s804_s18, %s862_s21  ;;  %p35_p0 = scmp.ne.s32.totalorder %s800_s17, %s796_s16 }
   0xb   : > { %p26_p1 = scmp.eq.s32.totalorder %s25_s23, 0  ;;  %p36_p2 = scmp.eq.s32.totalorder %s804_s18, 0 }
   0xc   : > { %p41_p3 = scmp.ne.s32.totalorder %s796_s16, %s792_s15  ;;  %p42_p4 = scmp.eq.s32.totalorder %s858_s19, 0 }
   0xd   : > { %s874_s24 = scalar_select %p26_p1, %s800_s17, %s28_s22  }
   0xe   : > { %p876_p5 = por %p36_p2, %p35_p0  ;;  %p882_p6 = por %p42_p4, %p41_p3 }
   0xf   : > { %p128_p7 = scmp.eq.s32.totalorder %s858_s19, 1  ;;  %p134_p8 = scmp.eq.s32.totalorder %s571_s20, 1 }
  0x10   : > { %p572_p9 = scmp.ge.s32.totalorder %s804_s18, 1  ;;  %p141_p10 = scmp.lt.s32.totalorder %s804_s18, 3 }
  0x11   : > { %p889_p11 = por %p128_p7, %p35_p0  ;;  %p893_p12 = por %p134_p8, %p41_p3 }
  0x12   : > { %p897_p13 = pnand %p572_p9, %p141_p10  ;;  %s1006_s2 = sld [smem:[#allocation11_spill]] }
  0x13   : > { %s806_s7 = smov [#allocation5]   ;;  %p616_p3 = scmp.lt.s32.totalorder %s804_s18, 2 }
  0x14   : > { %p603_p1 = pneg %p897_p13  ;;  %s158_s8 = sshll.u32 %s806_s7, 4  ;;  %s159_s8 = int_to_ptr.vmem [resolvable:$true] %s158_s8 }
  0x15   : > { %s172_s9 = sand.u32 1, %s800_s17   ;;  %p913_p7 = pnand %p616_p3, %p876_p5 }
  0x16   : > { %p604_p2 = pnand %p603_p1, %p42_p4  ;;  %s575_s11 = sshll.u32 %s172_s9, 5 }
  0x17   : > { %s588_s12 = sshll.u32 %s804_s18, 4  ;;  %s176_s23 = scalar_lea.vmem [#allocation2], %s575_s11 }
  0x18   : > { %s156_s6 = sshll.u32 %s1006_s2, 4  ;;  %s181_s20 = scalar_lea.hbm %s995_s0, %s588_s12  ;;  %s157_s6 = int_to_ptr.hbm [resolvable:$true] %s156_s6 }
  0x19   : > { %606 = dma.hbm_to_vmem [thread:$0]  (!%p604_p2), %s157_s6, 128, %s159_s8, [#allocation6]  }
  0x1a   : > { %s182_s22 = sshll.u32 %s181_s20, 4  ;;  %s184_s30 = sshll.u32 %s176_s23, 4  ;;  %s183_s22 = int_to_ptr.hbm [resolvable:$true] %s182_s22  ;;  %s185_s30 = int_to_ptr.vmem [resolvable:$true] %s184_s30 }
  0x1b   : > { %s173_s5 = scalar_lea.sflag [#allocation3], %s172_s9  ;;  %s704_s7 = sshra.s32 %s183_s22, 4  ;;  %s705_s7 = int_to_ptr.hbm [resolvable:$true] %s704_s7 }
  0x1c   : > { %s706_s25 = scalar_lea.hbm %s705_s7, 32  ;;  %p708_p8 = pneg %p913_p7 }
  0x1d   : > { %p707_p5 = scmp.ne.s32.totalorder %s705_s7, %s706_s25  ;;  %s711_s2 = scalar_lea.hbm %s995_s0, 64 }
  0x1e   : > { %p712_p1 = scmp.lt.s32.totalorder %s705_s7, %s995_s0  ;;  %p713_p2 = scmp.lt.s32.totalorder %s711_s2, %s706_s25 }
  0x1f   : > { %p709_p9 = pnand %p708_p8, %p707_p5 }
  0x20   : > { %p714_p3 = por %p713_p2, %p712_p1 }
  0x21   : > { %p710_p10 = pneg %p709_p9 }
  0x23   : > { %p715_p0 = pnand %p714_p3, %p710_p10 }
  0x25   : > { %718 = shalt.err (!%p715_p0)
}
  0x26   : > { %s807_s9 = smov 512   ;;  %s808_s11 = smov 256  }
  0x27   : > { %s809_s14 = smov 16   ;;  %196 = sbr.rel (%p897_p13) target bundleno = 862 (0x35e), region = 36 }
  0x28   : > { %610 = dma.hbm_to_vmem [thread:$0]  (!%p913_p7), %s183_s22, 512, %s185_s30, %s173_s5, %s807_s9, %s808_s11, %s809_s14  }
  0x29   : > { %s934_s20 = sand.u32 (!%p897_p13), 1, %s796_s16  }
  0x2a   : > { %s579_s23 = sshll.u32 (!%p897_p13), %s934_s20, 5  ;;  %s199_s2 = scalar_lea.sflag (!%p897_p13), [#allocation3], %s934_s20 }
  0x2b   : > { %s202_s7 = scalar_lea.vmem (!%p897_p13), [#allocation2], %s579_s23 }
  0x2c   : > { %779 = dma.done.wait (%p882_p6), %s199_s2, 512  }
  0x2d   : > { %781 = vsyncadd (%p882_p6), %s199_s2, 4294966784 }
  0x2e   : > { %783 = dma.done.wait (%p42_p4), [#allocation6], 128  }
  0x2f   : > { %785 = vsyncadd (%p42_p4), [#allocation6], 4294967168  ;;  %v810_v0 = vmov 0   ;;  %v236_v1 = vld [vmem:[%s202_s7 + $0x10] sm:$0xff]  ;;  %v237_v2 = vld [vmem:[%s202_s7 + $0x18] sm:$0xff]  ;;  %vm246_vm0 = vcmask 130048  }
  0x30   : > { %657 = vset.pattern.permute.xlu0 %v810_v0  ;;  %v234_v3 = vld [vmem:[%s202_s7] sm:$0xff]  ;;  %264 = vmatpush.msra.mxu0 %v236_v1  ;;  %v235_v4 = vld [vmem:[%s202_s7 + $0x8] sm:$0xff]  ;;  %vm429_vm15 = vcmask 7168   ;;  %s811_s25 = smov 1e-12   ;;  %s581_s8 = sshll.u32 %s934_s20, 3 }
  0x31   : > { %284 = vmatpush.msra.mxu1 %v237_v2  ;;  %v238_v5 = vld [vmem:[%s996_s1] sm:$0xff]  ;;  %367 = vmatpush.xpose.msra.mxu2 %v236_v1  ;;  %s585_s13 = sshll.u32 %s858_s19, 3  ;;  %s232_s23 = scalar_lea.vmem [#allocation7], %s581_s8 }
  0x32   : > { %v240_v6 = vld [vmem:[%s998_s3] sm:$0xff]  ;;  %265 = vmatpush.msra.mxu0 %v234_v3  ;;  %387 = vmatpush.xpose.msra.mxu3 %v237_v2  ;;  %s486_s11 = scalar_lea.hbm %s999_s4, %s585_s13  ;;  %s488_s2 = sshll.u32 %s232_s23, 4  ;;  %s489_s2 = int_to_ptr.vmem [resolvable:$true] %s488_s2 }
  0x33   : > { %243 = vperm.xlu0 %657, %v240_v6   ;;  %285 = vmatpush.msra.mxu1 %v235_v4  ;;  %v239_v1 = vld [vmem:[#allocation5] sm:$0xff]  ;;  %s490_s7 = sshll.u32 %s486_s11, 4  ;;  %s476_s29 = scalar_lea.sflag [#allocation4], %s934_s20  ;;  %s491_s7 = int_to_ptr.hbm [resolvable:$true] %s490_s7 }
  0x34   : > { %582 = vmatmul.msk.f32.vlgmr.msra.gmra.mxu0 %vm246_vm0, %v238_v5  ;;  %583 = vmatmul.msk.f32.vlgmr.msra.gmra.mxu1 %vm246_vm0, %v238_v5  ;;  %s748_s10 = sshra.s32 %s491_s7, 4  ;;  %s749_s10 = int_to_ptr.hbm [resolvable:$true] %s748_s10 }
  0x35   : > { %368 = vmatpush.xpose.msra.mxu2 %v234_v3  ;;  %s750_s19 = scalar_lea.hbm %s749_s10, 8  ;;  %p755_p0 = scmp.lt.s32.totalorder %s749_s10, %s999_s4 }
  0x36   : > { %388 = vmatpush.xpose.msra.mxu3 %v235_v4  ;;  %p751_p4 = scmp.ne.s32.totalorder %s749_s10, %s750_s19 }
  0x38   : > { %p752_p6 = pnand %p751_p4, %p889_p11 }
  0x3a   : > { %p753_p13 = pneg %p752_p6 }
  0xa5   : > { %v244_v7 = vpop.permute.xlu0 %243 }
  0xb1   : > { %v267_v8 = vpop.f32.mrf.mxu0  ;;  %v287_v9 = vpop.f32.mrf.mxu1 }
  0xb2   : > { %v268_v10 = vadd.f32 %v267_v8, %v244_v7  ;;  %v288_v11 = vadd.f32 %v287_v9, %v244_v7 }
  0xb4   : > { %v290_v12 = vrot.slane %v268_v10, 4  ;;  %v296_v13 = vrot.slane %v288_v11, 4 }
  0xb6   : > { %v291_v14 = vmax.f32 %v268_v10, %v290_v12  ;;  %v297_v15 = vmax.f32 %v288_v11, %v296_v13 }
  0xb8   : > { %v292_v16 = vrot.slane %v291_v14, 2  ;;  %v298_v17 = vrot.slane %v297_v15, 2 }
  0xba   : > { %v293_v18 = vmax.f32 %v291_v14, %v292_v16  ;;  %v299_v19 = vmax.f32 %v297_v15, %v298_v17 }
  0xbc   : > { %v294_v20 = vrot.slane %v293_v18, 1  ;;  %v300_v21 = vrot.slane %v299_v19, 1 }
  0xbe   : > { %v295_v22 = vmax.f32 %v293_v18, %v294_v20  ;;  %v301_v23 = vmax.f32 %v299_v19, %v300_v21 }
  0xc0   : > { %v302_v24 = vsub.f32 %v268_v10, %v295_v22  ;;  %v303_v25 = vsub.f32 %v288_v11, %v301_v23 }
  0xc2   : > { %v304_v26 = vmul.f32 1.442695, %v302_v24  ;;  %v306_v27 = vmul.f32 1.442695, %v303_v25 }
  0xc4   : > { %658 = vpow2.f32 %v304_v26 }
  0xc5   : > { %660 = vpow2.f32 %v306_v27 }
  0xca   : > { %v659_v28 = vpop.eup %658 }
  0xcb   : > { %v661_v29 = vpop.eup %660  ;;  %v308_v30 = vrot.slane %v659_v28, 4 }
  0xcc   : > { %v314_v31 = vrot.slane %v661_v29, 4 }
  0xcd   : > { %v309_v32 = vadd.f32 %v659_v28, %v308_v30 }
  0xce   : > { %v315_v33 = vadd.f32 %v661_v29, %v314_v31 }
  0xcf   : > { %v310_v34 = vrot.slane %v309_v32, 2 }
  0xd0   : > { %v316_v35 = vrot.slane %v315_v33, 2 }
  0xd1   : > { %v311_v36 = vadd.f32 %v310_v34, %v309_v32 }
  0xd2   : > { %v317_v37 = vadd.f32 %v316_v35, %v315_v33 }
  0xd3   : > { %v312_v38 = vrot.slane %v311_v36, 1 }
  0xd4   : > { %v318_v39 = vrot.slane %v317_v37, 1 }
  0xd5   : > { %v313_v40 = vadd.f32 %v312_v38, %v311_v36 }
  0xd6   : > { %v319_v41 = vadd.f32 %v318_v39, %v317_v37 }
  0xd7   : > { %662 = vrcp.f32 %v313_v40  ;;  %v331_v47 = vand.u32 2147483648, %v313_v40  ;;  %v329_v50 = vand.u32 2147483647, %v313_v40  ;;  %vm325_vm3 = vweird.f32 %v313_v40 }
  0xd8   : > { %664 = vrcp.f32 %v319_v41  ;;  %v345_v51 = vand.u32 2147483648, %v319_v41  ;;  %v343_v53 = vand.u32 2147483647, %v319_v41  ;;  %vm339_vm5 = vweird.f32 %v319_v41 }
  0xd9   : > { %v332_v55 = vor.u32 1.1754944e-38, %v331_v47  ;;  %vm330_vm6 = vcmp.eq.f32.partialorder %v329_v50, 8.507059e+37 }
  0xda   : > { %v346_v58 = vor.u32 1.1754944e-38, %v345_v51  ;;  %vm344_vm8 = vcmp.eq.f32.partialorder %v343_v53, 8.507059e+37 }
  0xdd   : > { %v663_v42 = vpop.eup %662 }
  0xde   : > { %v665_v43 = vpop.eup %664  ;;  %v321_v44 = vmul.f32 %v663_v42, %v313_v40  ;;  %vm326_vm1 = vweird.f32 %v663_v42 }
  0xdf   : > { %v335_v45 = vmul.f32 %v665_v43, %v319_v41  ;;  %vm340_vm2 = vweird.f32 %v665_v43  ;;  %vm327_vm4 = vmor %vm325_vm3, %vm326_vm1 }
  0xe0   : > { %v322_v46 = vsub.f32 1.0, %v321_v44  ;;  %vm341_vm7 = vmor %vm339_vm5, %vm340_vm2 }
  0xe1   : > { %v336_v48 = vsub.f32 1.0, %v335_v45 }
  0xe2   : > { %v323_v49 = vmul.f32 %v663_v42, %v322_v46 }
  0xe3   : > { %v337_v52 = vmul.f32 %v665_v43, %v336_v48 }
  0xe4   : > { %v324_v54 = vadd.f32 %v663_v42, %v323_v49 }
  0xe5   : > { %v338_v56 = vadd.f32 %v665_v43, %v337_v52 }
  0xe6   : > { %v328_v57 = vsel %vm327_vm4, %v663_v42, %v324_v54 }
  0xe7   : > { %v333_v59 = vsel %vm330_vm6, %v332_v55, %v328_v57  ;;  %v342_v60 = vsel %vm341_vm7, %v665_v43, %v338_v56 }
  0xe8   : > { %v348_v61 = vmul.f32 %v659_v28, %v333_v59  ;;  %v347_v62 = vsel %vm344_vm8, %v346_v58, %v342_v60 }
  0xe9   : > { %v349_v63 = vmul.f32 %v661_v29, %v347_v62 }
  0xea   : > { %369 = vmatmul.f32.vlgmr.msra.gmra.mxu2 %v348_v61 }
  0xeb   : > { %389 = vmatmul.f32.vlgmr.msra.gmra.mxu3 %v349_v63  ;;  %v350_v0 = vadd.f32 %v349_v63, %v348_v61 }
  0xed   : > { %351 = vadd.xlane.f32.xlu0 %v350_v0 }
 0x160   : > { %v352_v2 = vpop.xlane.xlu0 %351 }
 0x161   : > { %v393_v5 = vmul.f32 %v352_v2, %v239_v1 }
 0x16d   : > { %v370_v3 = vpop.f32.mrf.mxu2 }
 0x16e   : > { %v390_v4 = vpop.f32.mrf.mxu3 }
 0x16f   : > { %v391_v6 = vadd.f32 %v390_v4, %v370_v3 }
 0x171   : > { %v954_v7 = vsub.f32 %v391_v6, %v393_v5 }
 0x173   : > { %v395_v8 = vmul.f32 %v954_v7, %v954_v7 }
 0x175   : > { %v396_v9 = vsel %vm246_vm0, %v395_v8, 0.0 }
 0x176   : > { %397 = vadd.xlane.f32.xlu1 %v396_v9 }
 0x1e9   : > { %v398_v10 = vpop.xlane.xlu1 %397 }
 0x1ea   : > { %666 = vrsqrt.f32 %v398_v10  ;;  %vm406_vm9 = vcmp.eq.f32.partialorder %v398_v10, inf  ;;  %v409_v18 = vand.u32 2147483648, %v398_v10  ;;  %vm408_vm10 = vcmp.eq.f32.partialorder %v398_v10, 0.0 }
 0x1f0   : > { %v667_v11 = vpop.eup %666 }
 0x1f1   : > { %v400_v12 = vmul.f32 %v667_v11, %v398_v10 }
 0x1f3   : > { %v401_v13 = vmul.f32 %v667_v11, %v400_v12 }
 0x1f5   : > { %v402_v14 = vmul.f32 0.5, %v401_v13 }
 0x1f7   : > { %v403_v15 = vsub.f32 1.5, %v402_v14 }
 0x1f9   : > { %v404_v16 = vmul.f32 %v667_v11, %v403_v15 }
 0x1fb   : > { %v405_v17 = vmul.f32 %v404_v16, %v398_v10 }
 0x1fd   : > { %v407_v19 = vsel %vm406_vm9, %v398_v10, %v405_v17 }
 0x1fe   : > { %v410_v20 = vsel %vm408_vm10, %v409_v18, %v407_v19 }
 0x1ff   : > { %v411_v21 = vmax.f32 %v410_v20, 1e-12 }
 0x201   : > { %668 = vrcp.f32 %v411_v21  ;;  %v423_v25 = vand.u32 2147483648, %v411_v21  ;;  %v421_v27 = vand.u32 2147483647, %v411_v21  ;;  %vm417_vm12 = vweird.f32 %v411_v21 }
 0x203   : > { %v424_v29 = vor.u32 1.1754944e-38, %v423_v25  ;;  %vm422_vm14 = vcmp.eq.f32.partialorder %v421_v27, 8.507059e+37 }
 0x207   : > { %v669_v22 = vpop.eup %668 }
 0x208   : > { %v413_v23 = vmul.f32 %v669_v22, %v411_v21  ;;  %vm418_vm11 = vweird.f32 %v669_v22 }
 0x209   : > { %vm419_vm13 = vmor %vm417_vm12, %vm418_vm11 }
 0x20a   : > { %v414_v24 = vsub.f32 1.0, %v413_v23 }
 0x20c   : > { %v415_v26 = vmul.f32 %v669_v22, %v414_v24 }
 0x20e   : > { %v416_v28 = vadd.f32 %v669_v22, %v415_v26 }
 0x210   : > { %v420_v30 = vsel %vm419_vm13, %v669_v22, %v416_v28 }
 0x211   : > { %v425_v31 = vsel %vm422_vm14, %v424_v29, %v420_v30 }
 0x212   : > { %v427_v32 = vmul.f32 %v425_v31, %v425_v31 }
 0x214   : > { %v428_v33 = vmul.f32 %v427_v32, %v398_v10 }
 0x216   : > { %v430_v34 = vsel %vm429_vm15, %v428_v33, 0.0 }
 0x217   : > { %431 = vadd.xlane.f32.xlu1 %v430_v34 }
 0x28a   : > { %v432_v35 = vpop.xlane.xlu1 %431 }
 0x28b   : > { %v433_v36 = vrot.slane %v432_v35, 4 }
 0x28d   : > { %v434_v37 = vadd.f32 %v433_v36, %v432_v35 }
 0x28f   : > { %v435_v38 = vrot.slane %v434_v37, 2 }
 0x291   : > { %v436_v39 = vadd.f32 %v435_v38, %v434_v37 }
 0x293   : > { %v437_v40 = vrot.slane %v436_v39, 1 }
 0x295   : > { %v438_v41 = vadd.f32 %v437_v40, %v436_v39 }
 0x297   : > { %589 = vpush %v438_v41 }
 0x2c8   : > { %s590_s30 = spop %589 }
 0x2c9   : > { %v440_v42 = vstv %s590_s30  ;;  %s754_s30 = scalar_lea.hbm %s999_s4, 16 }
 0x2ca   : > { %670 = vrsqrt.f32 %v440_v42  ;;  %vm448_vm1 = vcmp.eq.f32.partialorder %v440_v42, inf  ;;  %v451_v50 = vand.u32 2147483648, %v440_v42  ;;  %vm450_vm2 = vcmp.eq.f32.partialorder %v440_v42, 0.0  ;;  %p756_p7 = scmp.lt.s32.totalorder %s754_s30, %s750_s19 }
 0x2cc   : > { %p757_p5 = por %p756_p7, %p755_p0 }
 0x2ce   : > { %p758_p8 = pnand %p757_p5, %p753_p13 }
 0x2d0   : > { %v671_v43 = vpop.eup %670 }
 0x2d1   : > { %v442_v44 = vmul.f32 %v671_v43, %v440_v42 }
 0x2d3   : > { %v443_v45 = vmul.f32 %v671_v43, %v442_v44 }
 0x2d5   : > { %v444_v46 = vmul.f32 0.5, %v443_v45 }
 0x2d7   : > { %v445_v47 = vsub.f32 1.5, %v444_v46 }
 0x2d9   : > { %v446_v48 = vmul.f32 %v671_v43, %v445_v47 }
 0x2db   : > { %v447_v49 = vmul.f32 %v446_v48, %v440_v42 }
 0x2dd   : > { %v449_v51 = vsel %vm448_vm1, %v440_v42, %v447_v49 }
 0x2de   : > { %v452_v52 = vsel %vm450_vm2, %v451_v50, %v449_v51 }
 0x2df   : > { %591 = vpush %v452_v52 }
 0x310   : > { %s592_s5 = spop %591 }
 0x311   : > { %s454_s6 = smax.f32 %s811_s25, %s592_s5 }
 0x312   : > { %v455_v53 = vstv %s454_s6 }
 0x313   : > { %672 = vrcp.f32 %v455_v53  ;;  %v467_v57 = vand.u32 2147483648, %v455_v53  ;;  %v465_v59 = vand.u32 2147483647, %v455_v53  ;;  %vm461_vm4 = vweird.f32 %v455_v53 }
 0x315   : > { %v468_v61 = vor.u32 1.1754944e-38, %v467_v57  ;;  %vm466_vm6 = vcmp.eq.f32.partialorder %v465_v59, 8.507059e+37 }
 0x319   : > { %v673_v54 = vpop.eup %672 }
 0x31a   : > { %v457_v55 = vmul.f32 %v673_v54, %v455_v53  ;;  %vm462_vm3 = vweird.f32 %v673_v54 }
 0x31b   : > { %vm463_vm5 = vmor %vm461_vm4, %vm462_vm3 }
 0x31c   : > { %v458_v56 = vsub.f32 1.0, %v457_v55 }
 0x31e   : > { %v459_v58 = vmul.f32 %v673_v54, %v458_v56 }
 0x320   : > { %v460_v60 = vadd.f32 %v673_v54, %v459_v58 }
 0x322   : > { %v464_v62 = vsel %vm463_vm5, %v673_v54, %v460_v60 }
 0x323   : > { %v469_v63 = vsel %vm466_vm6, %v468_v61, %v464_v62 }
 0x324   : > { %593 = vpush %v469_v63 }
 0x355   : > { %s594_s14 = spop %593 }
 0x356   : > { %v471_v0 = vstv %s594_s14 }
 0x357   : > { %v472_v1 = vmul.f32 %v471_v0, %v425_v31 }
 0x359   : > { %v473_v2 = vmul.f32 %v472_v1, %v954_v7 }
 0x35b   : > { %474 = vst.msk [vmem:[%s232_s23] sm:$0xff] %vm246_vm0, %v473_v2 }
 0x35c   : > { %761 = shalt.err (!%p758_p8)
}
 0x35d   : > { %601 = dma.vmem_to_hbm [thread:$0]  (%p889_p11), %s489_s2, 128, %s491_s7, %s476_s29  }
 0x35e PF: > { %s502_s20 = sand.u32 1, %s792_s15   ;;  %p1008_p9 = scmp.ge.s32.totalorder %s804_s18, 2 }
 0x35f   : > { %s503_s6 = scalar_lea.sflag [#allocation4], %s502_s20 }
 0x360   : > { %p612_p10 = pnand %p1008_p9, %p893_p12 }
 0x362   : > { %p613_p1 = pneg %p612_p10 }
 0x364   : > { %787 = dma.done.wait (%p613_p1), %s503_s6, 128  }
 0x365   : > { %789 = vsyncadd (%p613_p1), %s503_s6, 4294967168  ;;  %p18_p2 = scmp.ge.s32.totalorder %s862_s21, 4   ;;  %s1009_s15 = smov %s796_s16 }
 0x366   : > { %s1010_s16 = smov %s800_s17  ;;  %s1011_s17 = smov %s874_s24 }
 0x367   : > { %s1012_s18 = smov %s862_s21  ;;  %20 = sbr.rel (!%p18_p2) target bundleno = 8 (0x8), region = 85 }
 0x36c   :  { %509 = vsyncpa [#allocation3], 1 }
 0x36d   :  { %511 = vsyncpa [#allocation3 + $0x1], 1 }
 0x36e   :  { %512 = vsyncpa [#allocation6], 1 }
 0x36f   :  { %513 = vsyncpa [#allocation4], 1 }
 0x370   :  { %515 = vsyncpa [#allocation4 + $0x1], 1 }

</bundles_post_ra>
